<compile_context>
chip_gen: v6e
topology: v6e:2x2x1
jax: 0.10.0
libtpu: 0.0.40
codegen_flags: <defaults>
</compile_context>

<pallas_src>
import functools

import jax
import jax.numpy as jnp
from jax.experimental import pallas as pl
from jax.experimental.pallas import tpu as pltpu

_LANES = 128                       # vreg lane width
_ACC_ROWS = 32                     # resident accumulator sublanes (4 vregs)
_TARGET_BLOCK_BYTES = 2 * 1024 * 1024   # per-input, per-step DMA size


def _charbonnier_block_kernel(x_ref, y_ref, out_ref, *, eps2, rows, block_rows, steps):
    g = pl.program_id(0)   # chunk axis ("parallel"; TensorCore split on 2-TC parts)
    s = pl.program_id(1)   # sequential accumulation axis

    @pl.when(s == 0)
    def _init():
        out_ref[...] = jnp.zeros_like(out_ref)

    # Charbonnier term in f32 regardless of the HBM storage dtype.
    d = x_ref[...].astype(jnp.float32) - y_ref[...].astype(jnp.float32)
    c = jnp.sqrt(d * d + eps2)

    def accumulate(vals):
        # Fold block_rows sublanes into the resident (32, 128) block: pure
        # elementwise VPU adds (4 independent chains), no cross-lane XLU work
        # and no narrow masked stores in the hot loop.
        out_ref[...] += jnp.sum(
            vals.reshape(block_rows // _ACC_ROWS, _ACC_ROWS, _LANES), axis=0
        )

    # Rows of this block that lie inside the real array.  Only the final block
    # can be ragged; all others take the mask-free fast path.  (Row indices are
    # total/128 sized, so int32 is safe for any realistic tensor.)
    valid_rows = rows - (g * steps + s) * block_rows

    @pl.when(valid_rows >= block_rows)
    def _full_block():
        accumulate(c)

    @pl.when(valid_rows < block_rows)
    def _ragged_block():
        row = jax.lax.broadcasted_iota(jnp.int32, (block_rows, _LANES), 0)
        # jnp.where selects 0.0 for out-of-bounds rows, so any unspecified data
        # (including NaN/Inf garbage) in the ragged tail cannot leak in.
        accumulate(jnp.where(row < valid_rows, c, 0.0))


def _num_tensorcores_per_device():
    """Best-effort TensorCores per device (2 on v7x, 1 on v5e/v6e)."""
    try:
        info = pltpu.get_tpu_info()
    except Exception:
        return 1
    for attr in ("num_cores", "core_count", "num_tensorcores", "tensorcore_count"):
        n = getattr(info, attr, None)
        if isinstance(n, int) and n > 0:
            return max(1, min(int(n), 2))
    return 1


def charbonnier_loss(x, y, eps=1e-6, *, block_rows=None, num_chunks=None):
    """CharbonnierLoss(eps).forward(x, y) with x, y of shape (N, C, H, W)."""
    assert x.shape == y.shape, (x.shape, y.shape)
    b, ch, h, w = y.shape
    total = b * ch * h * w
    denom = float(b * ch * h * w)
    eps2 = float(eps) ** 2
    itemsize = int(jnp.dtype(x.dtype).itemsize)

    # --- lane-dense (rows, 128) view of the inputs, with NO padded copy ------
    # When total is a multiple of 128 the reshape is a free bitcast.  Otherwise
    # the (<128 element) remainder is handled with a tiny plain-jnp term and the
    # kernel consumes the aligned prefix.
    lanes_total = (total // _LANES) * _LANES
    tail_sum = jnp.float32(0.0)
    if lanes_total != total:
        xr = x.reshape(-1)
        yr = y.reshape(-1)
        xt = jax.lax.slice(xr, (lanes_total,), (total,)).astype(jnp.float32)
        yt = jax.lax.slice(yr, (lanes_total,), (total,)).astype(jnp.float32)
        tail_sum = jnp.sum(jnp.sqrt((xt - yt) ** 2 + eps2))
        xf = jax.lax.slice(xr, (0,), (lanes_total,)).reshape(-1, _LANES)
        yf = jax.lax.slice(yr, (0,), (lanes_total,)).reshape(-1, _LANES)
    else:
        xf = x.reshape(-1, _LANES)
        yf = y.reshape(-1, _LANES)

    rows = lanes_total // _LANES
    if rows == 0:  # degenerate tiny input: everything fit in the tail term
        return tail_sum / denom

    # --- block / grid selection ----------------------------------------------
    if block_rows is None:
        # Constant bytes-per-step across dtypes (~2 MiB per input block):
        # f32 -> 4096 rows, bf16 -> 8192 rows.
        block_rows = _TARGET_BLOCK_BYTES // (_LANES * itemsize)
    block_rows = max(_ACC_ROWS, (block_rows // _ACC_ROWS) * _ACC_ROWS)
    block_rows = min(block_rows, pl.cdiv(rows, _ACC_ROWS) * _ACC_ROWS)

    num_blocks = pl.cdiv(rows, block_rows)
    if num_chunks is None:
        num_chunks = _num_tensorcores_per_device()
    grid_g = max(1, min(int(num_chunks), num_blocks))
    if num_blocks % grid_g != 0:
        grid_g = 1  # keep every grid point's block index in-bounds (no OOB blocks)
    steps = num_blocks // grid_g

    kernel = functools.partial(
        _charbonnier_block_kernel,
        eps2=eps2,
        rows=rows,
        block_rows=block_rows,
        steps=steps,
    )

    partials = pl.pallas_call(
        kernel,
        out_shape=jax.ShapeDtypeStruct((grid_g * _ACC_ROWS, _LANES), jnp.float32),
        grid_spec=pltpu.PrefetchScalarGridSpec(
            num_scalar_prefetch=0,
            grid=(grid_g, steps),
            in_specs=[
                pl.BlockSpec((block_rows, _LANES), lambda g, s: (g * steps + s, 0)),
                pl.BlockSpec((block_rows, _LANES), lambda g, s: (g * steps + s, 0)),
            ],
            out_specs=pl.BlockSpec((_ACC_ROWS, _LANES), lambda g, s: (g, 0)),
        ),
        compiler_params=pltpu.CompilerParams(
            # TODO(synk): on v7x verify "parallel" actually shards the g axis
            # across both TensorCores; if not, switch that axis to
            # pltpu.CORE_PARALLEL.
            dimension_semantics=("parallel", "arbitrary"),
            # Explicit limit so the ~8 MiB double-buffered footprint is fine on
            # v5e's 16 MiB scoped default and within v7x's 64 MiB physical VMEM.
            vmem_limit_bytes=32 * 1024 * 1024,
        ),
        cost_estimate=pl.CostEstimate(
            flops=4 * total,
            transcendentals=total,
            bytes_accessed=2 * lanes_total * itemsize + grid_g * _ACC_ROWS * _LANES * 4,
        ),
    )(xf, yf)

    # Single final cross-lane reduction + PyTorch normalization (b*c*h*w).
    return (jnp.sum(partials) + tail_sum) / denom


def _reference_loss(x, y, eps=1e-6):
    """Pure-JAX reference matching the PyTorch CharbonnierLoss module."""
    b, c, h, w = y.shape
    return jnp.sum(jnp.sqrt((x - y) ** 2 + eps ** 2)) / (c * b * h * w)


if __name__ == "__main__":
    key = jax.random.PRNGKey(0)
    k1, k2 = jax.random.split(key)
    N, C, H, W = 2, 4, 16, 16
    x = jax.random.normal(k1, (N, C, H, W), dtype=jnp.float32)
    y = jax.random.normal(k2, (N, C, H, W), dtype=jnp.float32)

    loss = jax.block_until_ready(charbonnier_loss(x, y))
    ref = jax.block_until_ready(_reference_loss(x, y))
    assert jnp.allclose(loss, ref, rtol=1e-5, atol=1e-6), (loss, ref)

    print("KERNEL_OK")
</pallas_src>

<mosaic_0001>
module attributes {stable_mosaic.version = 11 : i64} {
  func.func @_charbonnier_block_kernel(%arg0: i32, %arg1: i32, %arg2: memref<32x128xf32, #tpu.memory_space<vmem>>, %arg3: memref<32x128xf32, #tpu.memory_space<vmem>>, %arg4: memref<32x128xf32, #tpu.memory_space<vmem>>) attributes {dimension_semantics = [#tpu.dimension_semantics<parallel>, #tpu.dimension_semantics<arbitrary>], iteration_bounds = array<i64: 1, 1>, scalar_prefetch = 0 : i64, scratch_operands = 0 : i64, tpu.core_type = #tpu.core_type<tc>, window_params = [{transform_indices = @transform_0, window_bounds = array<i64: 32, 128>}, {transform_indices = @transform_1, window_bounds = array<i64: 32, 128>}, {transform_indices = @transform_2, window_bounds = array<i64: 32, 128>}]} {
    %c0_i32 = arith.constant 0 : i32
    %0 = arith.cmpi eq, %arg1, %c0_i32 : i32
    %1 = arith.extui %0 : i1 to i32
    %c0_i32_0 = arith.constant 0 : i32
    %2 = arith.cmpi ne, %1, %c0_i32_0 : i32
    scf.if %2 {
      %cst_8 = arith.constant 0.000000e+00 : f32
      %20 = vector.broadcast %cst_8 : f32 to vector<32x128xf32>
      %c0_9 = arith.constant 0 : index
      %c0_10 = arith.constant 0 : index
      %21 = vector.load %arg4[%c0_9, %c0_10] : memref<32x128xf32, #tpu.memory_space<vmem>>, vector<32x128xf32>
      tpu.vector_store %arg4[%c0_9, %c0_10], %20 {strides = array<i32>} : memref<32x128xf32, #tpu.memory_space<vmem>>, vector<32x128xf32>,
    } else {
    }
    %c0 = arith.constant 0 : index
    %c0_1 = arith.constant 0 : index
    %3 = vector.load %arg2[%c0, %c0_1] : memref<32x128xf32, #tpu.memory_space<vmem>>, vector<32x128xf32>
    %c0_2 = arith.constant 0 : index
    %c0_3 = arith.constant 0 : index
    %4 = vector.load %arg3[%c0_2, %c0_3] : memref<32x128xf32, #tpu.memory_space<vmem>>, vector<32x128xf32>
    %5 = arith.subf %3, %4 : vector<32x128xf32>
    %6 = arith.mulf %5, %5 : vector<32x128xf32>
    %cst = arith.constant 9.99999996E-13 : f32
    %7 = vector.broadcast %cst : f32 to vector<32x128xf32>
    %8 = arith.addf %6, %7 : vector<32x128xf32>
    %9 = math.sqrt %8 : vector<32x128xf32>
    %c1_i32 = arith.constant 1 : i32
    %10 = arith.muli %arg0, %c1_i32 : i32
    %11 = arith.addi %10, %arg1 : i32
    %c32_i32 = arith.constant 32 : i32
    %12 = arith.muli %11, %c32_i32 : i32
    %c16_i32 = arith.constant 16 : i32
    %13 = arith.subi %c16_i32, %12 : i32
    %c32_i32_4 = arith.constant 32 : i32
    %14 = arith.cmpi sge, %13, %c32_i32_4 : i32
    %15 = arith.extui %14 : i1 to i32
    %c0_i32_5 = arith.constant 0 : i32
    %16 = arith.cmpi ne, %15, %c0_i32_5 : i32
    scf.if %16 {
      %c0_8 = arith.constant 0 : index
      %c0_9 = arith.constant 0 : index
      %20 = vector.load %arg4[%c0_8, %c0_9] : memref<32x128xf32, #tpu.memory_space<vmem>>, vector<32x128xf32>
      %21 = vector.shape_cast %9 : vector<32x128xf32> to vector<1x32x128xf32>
      %cst_10 = arith.constant dense<0.000000e+00> : vector<32x128xf32>
      %22 = vector.multi_reduction <add>, %21, %cst_10 [0] : vector<1x32x128xf32> to vector<32x128xf32>
      %23 = arith.addf %20, %22 : vector<32x128xf32>
      %c0_11 = arith.constant 0 : index
      %c0_12 = arith.constant 0 : index
      %24 = vector.load %arg4[%c0_11, %c0_12] : memref<32x128xf32, #tpu.memory_space<vmem>>, vector<32x128xf32>
      tpu.vector_store %arg4[%c0_11, %c0_12], %23 {strides = array<i32>} : memref<32x128xf32, #tpu.memory_space<vmem>>, vector<32x128xf32>,
    } else {
    }
    %c32_i32_6 = arith.constant 32 : i32
    %17 = arith.cmpi slt, %13, %c32_i32_6 : i32
    %18 = arith.extui %17 : i1 to i32
    %c0_i32_7 = arith.constant 0 : i32
    %19 = arith.cmpi ne, %18, %c0_i32_7 : i32
    scf.if %19 {
      %20 = tpu.iota {dimensions = array<i32: 0>} : vector<32x128xi32>
      %21 = vector.broadcast %13 : i32 to vector<32x128xi32>
      %22 = arith.cmpi slt, %20, %21 : vector<32x128xi32>
      %cst_8 = arith.constant 0.000000e+00 : f32
      %23 = vector.broadcast %cst_8 : f32 to vector<32x128xf32>
      %24 = arith.select %22, %9, %23 : vector<32x128xi1>, vector<32x128xf32>
      %c0_9 = arith.constant 0 : index
      %c0_10 = arith.constant 0 : index
      %25 = vector.load %arg4[%c0_9, %c0_10] : memref<32x128xf32, #tpu.memory_space<vmem>>, vector<32x128xf32>
      %26 = vector.shape_cast %24 : vector<32x128xf32> to vector<1x32x128xf32>
      %cst_11 = arith.constant dense<0.000000e+00> : vector<32x128xf32>
      %27 = vector.multi_reduction <add>, %26, %cst_11 [0] : vector<1x32x128xf32> to vector<32x128xf32>
      %28 = arith.addf %25, %27 : vector<32x128xf32>
      %c0_12 = arith.constant 0 : index
      %c0_13 = arith.constant 0 : index
      %29 = vector.load %arg4[%c0_12, %c0_13] : memref<32x128xf32, #tpu.memory_space<vmem>>, vector<32x128xf32>
      tpu.vector_store %arg4[%c0_12, %c0_13], %28 {strides = array<i32>} : memref<32x128xf32, #tpu.memory_space<vmem>>, vector<32x128xf32>,
    } else {
    }
    return
  }
  func.func @transform_0(%arg0: i32, %arg1: i32) -> (i32, i32) {
    %c1_i32 = arith.constant 1 : i32
    %0 = arith.muli %arg0, %c1_i32 : i32
    %1 = arith.addi %0, %arg1 : i32
    %c0_i32 = arith.constant 0 : i32
    %c0_i32_0 = arith.constant 0 : i32
    return %1, %c0_i32 : i32, i32
  }
  func.func @transform_1(%arg0: i32, %arg1: i32) -> (i32, i32) {
    %c1_i32 = arith.constant 1 : i32
    %0 = arith.muli %arg0, %c1_i32 : i32
    %1 = arith.addi %0, %arg1 : i32
    %c0_i32 = arith.constant 0 : i32
    %c0_i32_0 = arith.constant 0 : i32
    return %1, %c0_i32 : i32, i32
  }
  func.func @transform_2(%arg0: i32, %arg1: i32) -> (i32, i32) {
    %c0_i32 = arith.constant 0 : i32
    %c0_i32_0 = arith.constant 0 : i32
    return %arg0, %c0_i32 : i32, i32
  }
}

</mosaic_0001>

<bundles_post_ra>
// kernel: tpu_custom_call.1
= control target key start
LH: loop header
LB: loop body
LE: loop exit
PB: predicated region body
PF: predicated region fallthrough
CT: control target
= control target key end

     0   :  { %7 = vsyncpa [#allocation3], 0  ;;  %s310_s0 = inlined_call_operand.hbm [shape: f32[16,128], index: 0, kind: input, shape index: {}]   ;;  %s311_s1 = inlined_call_operand.hbm [shape: f32[16,128], index: 1, kind: input, shape index: {}]   ;;  %s312_s2 = inlined_call_operand.hbm [shape: f32[32,128], index: 2, kind: output, shape index: {}]  }
   0x1   :  { %8 = vsyncpa [#allocation6], 0 }
   0x2   :  { %9 = vsyncpa [#allocation4], 0 }
   0x3   :  { %18 = vsyncadd [#allocation3], 256  ;;  %s271_s9 = smov [#allocation2]  }
   0x4   :  { %s23_s10 = sshll.u32 %s271_s9, 4  ;;  %s24_s10 = int_to_ptr.vmem [resolvable:$true] %s23_s10 }
   0x5   :  { %s213_s11 = scalar_lea.vmem %s24_s10, 256  ;;  %s217_s12 = scalar_lea.vmem %s24_s10, 512 }
   0x6   :  { %p214_p0 = scmp.ne.s32.totalorder %s24_s10, %s213_s11  ;;  %p218_p1 = scmp.lt.s32.totalorder %s24_s10, %s24_s10 }
   0x7   :  { %p219_p2 = scmp.lt.s32.totalorder %s217_s12, %s213_s11 }
   0x9   :  { %p220_p3 = por %p219_p2, %p218_p1 }
   0xb   :  { %p221_p4 = pnand %p220_p3, %p214_p0 }
   0xd   :  { %224 = shalt.err (!%p221_p4)
}
   0xe   :  { %s272_s13 = smov 128   ;;  %s273_s14 = smov 8  }
   0xf   :  { %29 = dma.hbm_to_vmem [thread:$0]  %s310_s0, 256, %s24_s10, [#allocation3], %s272_s13, %s272_s13, %s273_s14  }
  0x10   :  { %38 = vsyncadd [#allocation6], 256  ;;  %s274_s17 = smov [#allocation5]  }
  0x11   :  { %s43_s18 = sshll.u32 %s274_s17, 4  ;;  %s44_s18 = int_to_ptr.vmem [resolvable:$true] %s43_s18 }
  0x12   :  { %s233_s19 = scalar_lea.vmem %s44_s18, 256  ;;  %s237_s20 = scalar_lea.vmem %s44_s18, 512 }
  0x13   :  { %p234_p5 = scmp.ne.s32.totalorder %s44_s18, %s233_s19  ;;  %p238_p6 = scmp.lt.s32.totalorder %s44_s18, %s44_s18 }
  0x14   :  { %p239_p7 = scmp.lt.s32.totalorder %s237_s20, %s233_s19 }
  0x16   :  { %p240_p8 = por %p239_p7, %p238_p6 }
  0x18   :  { %p241_p9 = pnand %p240_p8, %p234_p5 }
  0x1a   :  { %244 = shalt.err (!%p241_p9)
}
  0x1b   :  { %49 = dma.hbm_to_vmem [thread:$0]  %s311_s1, 256, %s44_s18, [#allocation6], %s272_s13, %s272_s13, %s273_s14  }
  0x1c   :  { %265 = dma.done.wait [#allocation3], 512  }
  0x1d   :  { %266 = vsyncadd [#allocation3], 4294966784 }
  0x1e   :  { %267 = dma.done.wait [#allocation6], 512  }
  0x1f   :  { %268 = vsyncadd [#allocation6], 4294966784  ;;  %v275_v0 = vmov 0.0   ;;  %v72_v1 = vld [vmem:[#allocation2] sm:$0xff]  ;;  %v73_v3 = vld [vmem:[#allocation2 + $0x8] sm:$0xff]  ;;  %s276_s0 = smov [#allocation7]  }
  0x20   :  { %175 = vst [vmem:[#allocation7 + $0x10] sm:$0xff] %v275_v0  ;;  %176 = vst [vmem:[#allocation7 + $0x18] sm:$0xff] %v275_v0  ;;  %v76_v2 = vld [vmem:[#allocation5] sm:$0xff]  ;;  %v77_v5 = vld [vmem:[#allocation5 + $0x8] sm:$0xff]  ;;  %s182_s1 = sshll.u32 %s276_s0, 4  ;;  %s183_s1 = int_to_ptr.vmem [resolvable:$true] %s182_s1 }
  0x21   :  { %v80_v4 = vsub.f32 %v72_v1, %v76_v2  ;;  %v81_v6 = vsub.f32 %v73_v3, %v77_v5  ;;  %s245_s23 = scalar_lea.vmem %s183_s1, 512  ;;  %p250_p11 = scmp.lt.s32.totalorder %s183_s1, %s183_s1 }
  0x22   :  { %p246_p10 = scmp.ne.s32.totalorder %s183_s1, %s245_s23  ;;  %p251_p12 = scmp.lt.s32.totalorder %s245_s23, %s245_s23 }
  0x23   :  { %v84_v7 = vmul.f32 %v80_v4, %v80_v4  ;;  %v85_v8 = vmul.f32 %v81_v6, %v81_v6 }
  0x24   :  { %p252_p13 = por %p251_p12, %p250_p11 }
  0x25   :  { %v88_v9 = vadd.f32 1e-12, %v84_v7  ;;  %v89_v10 = vadd.f32 1e-12, %v85_v8 }
  0x26   :  { %p253_p0 = pnand %p252_p13, %p246_p10 }
  0x27   :  { %201 = vrsqrt.f32 %v88_v9  ;;  %vm94_vm0 = vcmp.eq.f32.partialorder %v88_v9, inf  ;;  %v97_v12 = vand.u32 2147483648, %v88_v9  ;;  %vm96_vm1 = vcmp.eq.f32.partialorder %v88_v9, 0.0 }
  0x28   :  { %203 = vrsqrt.f32 %v89_v10  ;;  %vm101_vm2 = vcmp.eq.f32.partialorder %v89_v10, inf  ;;  %v104_v15 = vand.u32 2147483648, %v89_v10  ;;  %vm103_vm3 = vcmp.eq.f32.partialorder %v89_v10, 0.0 }
  0x34   :  { %v202_v11 = vpop.eup %201 }
  0x35   :  { %v204_v13 = vpop.eup %203  ;;  %v93_v14 = vmul.f32 %v202_v11, %v88_v9 }
  0x36   :  { %v100_v16 = vmul.f32 %v204_v13, %v89_v10 }
  0x37   :  { %v95_v17 = vsel %vm94_vm0, %v88_v9, %v93_v14 }
  0x38   :  { %v98_v18 = vsel %vm96_vm1, %v97_v12, %v95_v17  ;;  %v102_v19 = vsel %vm101_vm2, %v89_v10, %v100_v16 }
  0x39   :  { %v105_v20 = vsel %vm103_vm3, %v104_v15, %v102_v19  ;;  %173 = vst [vmem:[#allocation7] sm:$0xff] %v98_v18 }
  0x3a   :  { %174 = vst [vmem:[#allocation7 + $0x8] sm:$0xff] %v105_v20 }
  0x3b   :  { %256 = shalt.err (!%p253_p0)
}
  0x3c   :  { %188 = dma.vmem_to_hbm [thread:$0]  %s183_s1, 512, %s312_s2, [#allocation4], %s272_s13, %s272_s13, %s273_s14  }
  0x3d   :  { %269 = dma.done.wait [#allocation4], 512  }
  0x3e   :  { %270 = vsyncadd [#allocation4], 4294966784 }
  0x3f   :  { %192 = vsyncpa [#allocation3], 1 }
  0x40   :  { %193 = vsyncpa [#allocation6], 1 }
  0x41   :  { %194 = vsyncpa [#allocation4], 1 }

</bundles_post_ra>
